<compile_context>
chip_gen: v6e
topology: v6e:2x2x1
jax: 0.10.0
libtpu: 0.0.40
codegen_flags: <defaults>
</compile_context>

<pallas_src>
import functools

import jax
import jax.numpy as jnp
from jax.experimental import pallas as pl
from jax.experimental.pallas import tpu as pltpu

LANE = 128      # vreg lane width (last dim)
SUBLANE = 8     # vreg sublane width (second-to-last dim, f32)


def _round_up(n, m):
    return ((n + m - 1) // m) * m


# ---------------------------------------------------------------------------
# Kernel: one fused forward pass over a batch tile.
# ---------------------------------------------------------------------------
def classifier_kernel(x_ref, y_ref, p_ref, o_ref, *, dims):
    """x_ref:[TB,cx]  y_ref:[TB,cy]  p_ref:[R,W] packed params  o_ref:[TB,co]."""
    (cx, ch, cy, co,
     r_w1, r_w2t, r_w2y, r_w3, r_b1, r_b2, r_b3) = dims

    x = x_ref[...]
    y = y_ref[...]

    # Static, lane-aligned slices of the single packed parameter buffer.
    w1 = p_ref[r_w1:r_w1 + cx, 0:ch]
    w2t = p_ref[r_w2t:r_w2t + ch, 0:ch]
    w2y = p_ref[r_w2y:r_w2y + cy, 0:ch]
    w3 = p_ref[r_w3:r_w3 + ch, 0:co]
    b1 = p_ref[r_b1:r_b1 + 1, 0:ch]
    b2 = p_ref[r_b2:r_b2 + 1, 0:ch]
    b3 = p_ref[r_b3:r_b3 + 1, 0:co]

    f32 = jnp.float32

    # fc1 + ReLU (dropout == identity in eval mode).
    h1 = jnp.dot(x, w1, preferred_element_type=f32) + b1.astype(f32)
    h1 = jnp.maximum(h1, 0.0).astype(x.dtype)

    # fc2(cat([h1, y])) + ReLU, concat folded into split weights.
    h2 = (jnp.dot(h1, w2t, preferred_element_type=f32)
          + jnp.dot(y, w2y, preferred_element_type=f32)
          + b2.astype(f32))
    h2 = jnp.maximum(h2, 0.0).astype(x.dtype)

    # output linear -> lane-dense padded output slab.
    out = jnp.dot(h2, w3, preferred_element_type=f32) + b3.astype(f32)
    o_ref[...] = out.astype(o_ref.dtype)


# ---------------------------------------------------------------------------
# Parameter packing: all weights/biases into one lane-padded buffer.
# ---------------------------------------------------------------------------
def pack_params(w1, b1, w2t, w2y, b2, w3, b3, dtype=jnp.float32):
    """Zero-pad every feature dim to 128 lanes and stack into one 2-D buffer.

    Padded lanes/rows are zero, so they contribute exactly 0 to every matmul
    and the padded output columns are exactly 0 (sliced off by the wrapper).
    """
    hs, hd = w1.shape
    yd = w2y.shape[0]          # 24
    od = w3.shape[1]

    cx = _round_up(hs, LANE)
    ch = _round_up(hd, LANE)
    cy = _round_up(yd, LANE)
    co = _round_up(od, LANE)
    wmax = max(ch, co)

    r_w1 = 0
    r_w2t = r_w1 + cx
    r_w2y = r_w2t + ch
    r_w3 = r_w2y + cy
    r_b1 = r_w3 + ch
    r_b2 = r_b1 + SUBLANE
    r_b3 = r_b2 + SUBLANE
    total_rows = r_b3 + SUBLANE

    buf = jnp.zeros((total_rows, wmax), dtype)

    def put(b, arr, r0):
        return jax.lax.dynamic_update_slice(b, arr.astype(dtype), (r0, 0))

    buf = put(buf, w1, r_w1)
    buf = put(buf, w2t, r_w2t)
    buf = put(buf, w2y, r_w2y)
    buf = put(buf, w3, r_w3)
    buf = put(buf, b1.reshape(1, -1), r_b1)
    buf = put(buf, b2.reshape(1, -1), r_b2)
    buf = put(buf, b3.reshape(1, -1), r_b3)

    dims = (cx, ch, cy, co, r_w1, r_w2t, r_w2y, r_w3, r_b1, r_b2, r_b3)
    return buf, dims


# ---------------------------------------------------------------------------
# Wrapper
# ---------------------------------------------------------------------------
def classifier_forward(x, y, packed, dims, out_dim, *, batch_tile=512):
    """x: [B, hidden_state_size], y: [B, 24] -> [B, out_dim] (float32)."""
    cx, ch, cy, co = dims[:4]
    B, hs = x.shape
    yd = y.shape[1]
    dtype = packed.dtype
    kernel = functools.partial(classifier_kernel, dims=dims)

    use_grid = B > batch_tile
    if use_grid:
        b_pad = _round_up(B, batch_tile)
    else:
        b_pad = _round_up(max(B, SUBLANE), SUBLANE)

    # Zero-padded, lane-aligned inputs (padded rows/cols contribute nothing).
    xp = jnp.zeros((b_pad, cx), dtype).at[:B, :hs].set(x.astype(dtype))
    yp = jnp.zeros((b_pad, cy), dtype).at[:B, :yd].set(y.astype(dtype))

    itemsize = jnp.dtype(dtype).itemsize
    flops = 2 * b_pad * (cx * ch + ch * ch + cy * ch + ch * co)
    bytes_accessed = (xp.size + yp.size + packed.size) * itemsize + b_pad * co * 4
    cost = pl.CostEstimate(flops=flops, transcendentals=0,
                           bytes_accessed=bytes_accessed)

    out_shape = jax.ShapeDtypeStruct((b_pad, co), jnp.float32)

    if not use_grid:
        # Latency-bound small-batch path: no grid, whole arrays in VMEM,
        # exactly 3 input DMAs (x, y, packed params) + 1 output DMA.
        out = pl.pallas_call(
            kernel,
            out_shape=out_shape,
            in_specs=[pl.BlockSpec(memory_space=pltpu.MemorySpace.VMEM)] * 3,
            out_specs=pl.BlockSpec(memory_space=pltpu.MemorySpace.VMEM),
            cost_estimate=cost,
        )(xp, yp, packed)
    else:
        # Large-batch path: tile only the batch axis; parameters get a
        # constant index_map (stay resident, no re-DMA); batch axis is
        # "parallel" so v7x can shard tiles across its two TensorCores.
        grid = (b_pad // batch_tile,)
        out = pl.pallas_call(
            kernel,
            out_shape=out_shape,
            grid=grid,
            in_specs=[
                pl.BlockSpec((batch_tile, cx), lambda i: (i, 0)),
                pl.BlockSpec((batch_tile, cy), lambda i: (i, 0)),
                pl.BlockSpec(packed.shape, lambda i: (0, 0)),
            ],
            out_specs=pl.BlockSpec((batch_tile, co), lambda i: (i, 0)),
            compiler_params=pltpu.CompilerParams(
                dimension_semantics=("parallel",)),
            cost_estimate=cost,
        )(xp, yp, packed)

    return out[:B, :out_dim]


# ---------------------------------------------------------------------------
# Deterministic synthetic parameters (PyTorch nn.Linear-style init,
# pre-transposed to [in, out]; fc2 split into tmp-part and y-part).
# ---------------------------------------------------------------------------
def init_params(key, hidden_state_size, hidden_dim, output_dim):
    ks = jax.random.split(key, 6)

    def linear(kw, kb, fan_in, fan_out):
        bound = 1.0 / jnp.sqrt(fan_in)
        w = jax.random.uniform(kw, (fan_in, fan_out), jnp.float32, -bound, bound)
        b = jax.random.uniform(kb, (1, fan_out), jnp.float32, -bound, bound)
        return w, b

    w1, b1 = linear(ks[0], ks[1], hidden_state_size, hidden_dim)

    bound2 = 1.0 / jnp.sqrt(hidden_dim + 24)
    w2_full = jax.random.uniform(ks[2], (hidden_dim + 24, hidden_dim),
                                 jnp.float32, -bound2, bound2)
    b2 = jax.random.uniform(ks[3], (1, hidden_dim), jnp.float32, -bound2, bound2)
    w2t, w2y = w2_full[:hidden_dim, :], w2_full[hidden_dim:, :]

    w3, b3 = linear(ks[4], ks[5], hidden_dim, output_dim)
    return (w1, b1, w2t, w2y, b2, w3, b3)


def reference_forward(x, y, params):
    w1, b1, w2t, w2y, b2, w3, b3 = params
    h1 = jnp.maximum(x @ w1 + b1, 0.0)
    h2 = jnp.maximum(h1 @ w2t + y @ w2y + b2, 0.0)
    return h2 @ w3 + b3


if __name__ == "__main__":
    hidden_state_size = 32
    hidden_dim = 32
    output_dim = 8
    batch = 8

    key = jax.random.PRNGKey(0)
    kx, ky, kp, kxb, kyb = jax.random.split(key, 5)

    x = jax.random.normal(kx, (batch, hidden_state_size), jnp.float32)
    y = jax.random.normal(ky, (batch, 24), jnp.float32)
    params = init_params(kp, hidden_state_size, hidden_dim, output_dim)
    ref = reference_forward(x, y, params)

    # --- f32 path, no grid (latency/overhead-optimized small batch) ---------
    packed_f32, dims_f32 = pack_params(*params, dtype=jnp.float32)
    out = classifier_forward(x, y, packed_f32, dims_f32, output_dim)
    jax.block_until_ready(out)
    assert out.shape == (batch, output_dim)
    assert jnp.allclose(out, ref, atol=1e-4, rtol=1e-4)

    # --- bf16 operand path (MXU-native on v6e/v7x), f32 accumulation --------
    packed_bf16, dims_bf16 = pack_params(*params, dtype=jnp.bfloat16)
    out_bf16 = classifier_forward(x, y, packed_bf16, dims_bf16, output_dim)
    jax.block_until_ready(out_bf16)
    assert float(jnp.max(jnp.abs(out_bf16 - ref))) < 0.1

    # --- batch-tiled grid path with "parallel" semantics (larger batch) -----
    batch_big = 1024
    xb = jax.random.normal(kxb, (batch_big, hidden_state_size), jnp.float32)
    yb = jax.random.normal(kyb, (batch_big, 24), jnp.float32)
    out_big = classifier_forward(xb, yb, packed_f32, dims_f32, output_dim,
                                 batch_tile=256)
    jax.block_until_ready(out_big)
    ref_big = reference_forward(xb, yb, params)
    assert jnp.allclose(out_big, ref_big, atol=1e-4, rtol=1e-4)

    print("KERNEL_OK")
</pallas_src>

<mosaic_0001>
module attributes {stable_mosaic.version = 11 : i64} {
  func.func @classifier_kernel(%arg0: memref<8x128xf32, #tpu.memory_space<vmem>>, %arg1: memref<8x128xf32, #tpu.memory_space<vmem>>, %arg2: memref<536x128xf32, #tpu.memory_space<vmem>>, %arg3: memref<8x128xf32, #tpu.memory_space<vmem>>) attributes {dimension_semantics = [], scalar_prefetch = 0 : i64, scratch_operands = 0 : i64, tpu.core_type = #tpu.core_type<tc>} {
    %c0 = arith.constant 0 : index
    %c0_0 = arith.constant 0 : index
    %0 = vector.load %arg0[%c0, %c0_0] : memref<8x128xf32, #tpu.memory_space<vmem>>, vector<8x128xf32>
    %c0_1 = arith.constant 0 : index
    %c0_2 = arith.constant 0 : index
    %1 = vector.load %arg1[%c0_1, %c0_2] : memref<8x128xf32, #tpu.memory_space<vmem>>, vector<8x128xf32>
    %c0_3 = arith.constant 0 : index
    %c0_4 = arith.constant 0 : index
    %2 = vector.load %arg2[%c0_3, %c0_4] : memref<536x128xf32, #tpu.memory_space<vmem>>, vector<128x128xf32>
    %c128 = arith.constant 128 : index
    %c0_5 = arith.constant 0 : index
    %3 = vector.load %arg2[%c128, %c0_5] : memref<536x128xf32, #tpu.memory_space<vmem>>, vector<128x128xf32>
    %c256 = arith.constant 256 : index
    %c0_6 = arith.constant 0 : index
    %4 = vector.load %arg2[%c256, %c0_6] : memref<536x128xf32, #tpu.memory_space<vmem>>, vector<128x128xf32>
    %c384 = arith.constant 384 : index
    %c0_7 = arith.constant 0 : index
    %5 = vector.load %arg2[%c384, %c0_7] : memref<536x128xf32, #tpu.memory_space<vmem>>, vector<128x128xf32>
    %c512 = arith.constant 512 : index
    %c0_8 = arith.constant 0 : index
    %6 = vector.load %arg2[%c512, %c0_8] : memref<536x128xf32, #tpu.memory_space<vmem>>, vector<1x128xf32>
    %c520 = arith.constant 520 : index
    %c0_9 = arith.constant 0 : index
    %7 = vector.load %arg2[%c520, %c0_9] : memref<536x128xf32, #tpu.memory_space<vmem>>, vector<1x128xf32>
    %c528 = arith.constant 528 : index
    %c0_10 = arith.constant 0 : index
    %8 = vector.load %arg2[%c528, %c0_10] : memref<536x128xf32, #tpu.memory_space<vmem>>, vector<1x128xf32>
    %cst = arith.constant dense<0.000000e+00> : vector<8x128xf32>
    %9 = tpu.matmul %0, %2, %cst {dimension_numbers = #tpu.dot_dimension_numbers<[1], [0], [0], [1], [0, 0, 1, 1], [], []>} : vector<8x128xf32>, vector<128x128xf32>, vector<8x128xf32> -> vector<8x128xf32>
    %10 = vector.broadcast %6 : vector<1x128xf32> to vector<8x128xf32>
    %11 = arith.addf %9, %10 : vector<8x128xf32>
    %cst_11 = arith.constant 0.000000e+00 : f32
    %12 = vector.broadcast %cst_11 : f32 to vector<8x128xf32>
    %13 = arith.maximumf %11, %12 : vector<8x128xf32>
    %cst_12 = arith.constant dense<0.000000e+00> : vector<8x128xf32>
    %14 = tpu.matmul %13, %3, %cst_12 {dimension_numbers = #tpu.dot_dimension_numbers<[1], [0], [0], [1], [0, 0, 1, 1], [], []>} : vector<8x128xf32>, vector<128x128xf32>, vector<8x128xf32> -> vector<8x128xf32>
    %cst_13 = arith.constant dense<0.000000e+00> : vector<8x128xf32>
    %15 = tpu.matmul %1, %4, %cst_13 {dimension_numbers = #tpu.dot_dimension_numbers<[1], [0], [0], [1], [0, 0, 1, 1], [], []>} : vector<8x128xf32>, vector<128x128xf32>, vector<8x128xf32> -> vector<8x128xf32>
    %16 = arith.addf %14, %15 : vector<8x128xf32>
    %17 = vector.broadcast %7 : vector<1x128xf32> to vector<8x128xf32>
    %18 = arith.addf %16, %17 : vector<8x128xf32>
    %cst_14 = arith.constant 0.000000e+00 : f32
    %19 = vector.broadcast %cst_14 : f32 to vector<8x128xf32>
    %20 = arith.maximumf %18, %19 : vector<8x128xf32>
    %cst_15 = arith.constant dense<0.000000e+00> : vector<8x128xf32>
    %21 = tpu.matmul %20, %5, %cst_15 {dimension_numbers = #tpu.dot_dimension_numbers<[1], [0], [0], [1], [0, 0, 1, 1], [], []>} : vector<8x128xf32>, vector<128x128xf32>, vector<8x128xf32> -> vector<8x128xf32>
    %22 = vector.broadcast %8 : vector<1x128xf32> to vector<8x128xf32>
    %23 = arith.addf %21, %22 : vector<8x128xf32>
    %c0_16 = arith.constant 0 : index
    %c0_17 = arith.constant 0 : index
    %24 = vector.load %arg3[%c0_16, %c0_17] : memref<8x128xf32, #tpu.memory_space<vmem>>, vector<8x128xf32>
    tpu.vector_store %arg3[%c0_16, %c0_17], %23 {strides = array<i32>} : memref<8x128xf32, #tpu.memory_space<vmem>>, vector<8x128xf32>,
    return
  }
}

</mosaic_0001>

<bundles_post_ra>
// kernel: tpu_custom_call.1
= control target key start
LH: loop header
LB: loop body
LE: loop exit
PB: predicated region body
PF: predicated region fallthrough
CT: control target
= control target key end

     0   :  { %8 = vsyncpa [#allocation3], 0  ;;  %s850_s0 = inlined_call_operand.hbm [shape: f32[8,128], index: 0, kind: input, shape index: {}]   ;;  %s851_s1 = inlined_call_operand.hbm [shape: f32[8,128], index: 1, kind: input, shape index: {}]   ;;  %s852_s2 = inlined_call_operand.hbm [shape: f32[536,128], index: 2, kind: input, shape index: {}]   ;;  %s853_s3 = inlined_call_operand.hbm [shape: f32[8,128], index: 3, kind: output, shape index: {}]  }
   0x1   :  { %9 = vsyncpa [#allocation6], 0 }
   0x2   :  { %10 = vsyncpa [#allocation4], 0  ;;  %s738_s12 = smov [#allocation5]   ;;  %s739_s14 = smov [#allocation2]  }
   0x3   :  { %s27_s13 = sshll.u32 %s738_s12, 4  ;;  %s17_s15 = sshll.u32 %s739_s14, 4  ;;  %s28_s13 = int_to_ptr.vmem [resolvable:$true] %s27_s13  ;;  %s18_s15 = int_to_ptr.vmem [resolvable:$true] %s17_s15 }
   0x4   :  { %s660_s16 = scalar_lea.vmem %s28_s13, 128  ;;  %p665_p1 = scmp.lt.s32.totalorder %s28_s13, %s28_s13 }
   0x5   :  { %p661_p0 = scmp.ne.s32.totalorder %s28_s13, %s660_s16  ;;  %p666_p2 = scmp.lt.s32.totalorder %s660_s16, %s660_s16 }
   0x7   :  { %p667_p3 = por %p666_p2, %p665_p1 }
   0x9   :  { %p668_p4 = pnand %p667_p3, %p661_p0 }
   0xb   :  { %671 = shalt.err (!%p668_p4)
}
   0xc   :  { %30 = dma.hbm_to_vmem [thread:$0]  %s851_s1, 128, %s28_s13, [#allocation6]  }
   0xd   :  { %s680_s19 = scalar_lea.vmem %s18_s15, 128  ;;  %p685_p6 = scmp.lt.s32.totalorder %s18_s15, %s18_s15 }
   0xe   :  { %p681_p5 = scmp.ne.s32.totalorder %s18_s15, %s680_s19  ;;  %p686_p7 = scmp.lt.s32.totalorder %s680_s19, %s680_s19 }
  0x10   :  { %p687_p8 = por %p686_p7, %p685_p6 }
  0x12   :  { %p688_p9 = pnand %p687_p8, %p681_p5 }
  0x14   :  { %691 = shalt.err (!%p688_p9)
}
  0x15   :  { %20 = dma.hbm_to_vmem [thread:$0]  %s850_s0, 128, %s18_s15, [#allocation3]  }
  0x16   :  { %s740_s22 = smov [#allocation7]  }
  0x17   :  { %s36_s23 = sshll.u32 %s740_s22, 4  ;;  %s37_s23 = int_to_ptr.vmem [resolvable:$true] %s36_s23 }
  0x18   :  { %s700_s24 = scalar_lea.vmem %s37_s23, 8576  ;;  %p705_p11 = scmp.lt.s32.totalorder %s37_s23, %s37_s23 }
  0x19   :  { %p701_p10 = scmp.ne.s32.totalorder %s37_s23, %s700_s24  ;;  %p706_p12 = scmp.lt.s32.totalorder %s700_s24, %s700_s24 }
  0x1b   :  { %p707_p13 = por %p706_p12, %p705_p11 }
  0x1d   :  { %p708_p0 = pnand %p707_p13, %p701_p10 }
  0x1f   :  { %711 = shalt.err (!%p708_p0)
}
  0x20   :  { %s741_s1 = smov 128   ;;  %s742_s25 = smov 8  }
  0x21   :  { %42 = dma.hbm_to_vmem [thread:$0]  %s852_s2, 8576, %s37_s23, [#allocation6], %s741_s1, %s741_s1, %s742_s25  }
  0x22   :  { %732 = dma.done.wait [#allocation3], 128  }
  0x23   :  { %733 = vsyncadd [#allocation3], 4294967168 }
  0x24   :  { %734 = dma.done.wait [#allocation6], 8704  }
  0x25   :  { %735 = vsyncadd [#allocation6], 4294958592  ;;  %v743_v0 = vmov 0.0   ;;  %vm744_vm0 = vmmov 0   ;;  %v69_v1 = vld [vmem:[#allocation7 + $0x78] sm:$0xff]  ;;  %v68_v2 = vld [vmem:[#allocation7 + $0x70] sm:$0xff] }
  0x26   :  { %504 = vmatprep.subr.mxu0 %v743_v0  ;;  %536 = vmatprep.mubr.msk.f32.mxu0 %vm744_vm0, %v743_v0  ;;  %v67_v3 = vld [vmem:[#allocation7 + $0x68] sm:$0xff]  ;;  %v66_v4 = vld [vmem:[#allocation7 + $0x60] sm:$0xff]  ;;  %v101_v5 = vld [vmem:[#allocation7 + $0x178] sm:$0xff]  ;;  %s745_s0 = smov [#allocation8]  }
  0x27   :  { %539 = vmatprep.subr.mxu1 %v743_v0  ;;  %571 = vmatprep.mubr.msk.f32.mxu1 %vm744_vm0, %v743_v0  ;;  %v65_v6 = vld [vmem:[#allocation7 + $0x58] sm:$0xff]  ;;  %v100_v7 = vld [vmem:[#allocation7 + $0x170] sm:$0xff]  ;;  %v99_v8 = vld [vmem:[#allocation7 + $0x168] sm:$0xff]  ;;  %s423_s2 = sshll.u32 %s745_s0, 4  ;;  %s424_s2 = int_to_ptr.vmem [resolvable:$true] %s423_s2 }
  0x28   :  { %505 = vmatpush3.msra.mxu0 %v69_v1  ;;  %540 = vmatpush3.msra.mxu1 %v101_v5  ;;  %v64_v9 = vld [vmem:[#allocation7 + $0x50] sm:$0xff]  ;;  %v98_v10 = vld [vmem:[#allocation7 + $0x160] sm:$0xff]  ;;  %v63_v11 = vld [vmem:[#allocation7 + $0x48] sm:$0xff]  ;;  %s712_s28 = scalar_lea.vmem %s424_s2, 128  ;;  %p717_p2 = scmp.lt.s32.totalorder %s424_s2, %s424_s2 }
  0x29   :  { %506 = vmatprep.subr.mxu0 %v743_v0  ;;  %541 = vmatprep.subr.mxu1 %v743_v0  ;;  %v97_v12 = vld [vmem:[#allocation7 + $0x158] sm:$0xff]  ;;  %v62_v13 = vld [vmem:[#allocation7 + $0x40] sm:$0xff]  ;;  %v96_v14 = vld [vmem:[#allocation7 + $0x150] sm:$0xff]  ;;  %p713_p1 = scmp.ne.s32.totalorder %s424_s2, %s712_s28  ;;  %p718_p3 = scmp.lt.s32.totalorder %s712_s28, %s712_s28 }
  0x2a   :  { %507 = vmatpush3.msra.mxu0 %v68_v2  ;;  %542 = vmatpush3.msra.mxu1 %v100_v7  ;;  %v61_v15 = vld [vmem:[#allocation7 + $0x38] sm:$0xff]  ;;  %v95_v16 = vld [vmem:[#allocation7 + $0x148] sm:$0xff]  ;;  %v60_v17 = vld [vmem:[#allocation7 + $0x30] sm:$0xff] }
  0x2b   :  { %508 = vmatprep.subr.mxu0 %v743_v0  ;;  %543 = vmatprep.subr.mxu1 %v743_v0  ;;  %v94_v18 = vld [vmem:[#allocation7 + $0x140] sm:$0xff]  ;;  %v59_v19 = vld [vmem:[#allocation7 + $0x28] sm:$0xff]  ;;  %v93_v20 = vld [vmem:[#allocation7 + $0x138] sm:$0xff]  ;;  %p719_p4 = por %p718_p3, %p717_p2 }
  0x2c   :  { %509 = vmatpush3.msra.mxu0 %v67_v3  ;;  %544 = vmatpush3.msra.mxu1 %v99_v8  ;;  %v58_v21 = vld [vmem:[#allocation7 + $0x20] sm:$0xff]  ;;  %v92_v22 = vld [vmem:[#allocation7 + $0x130] sm:$0xff]  ;;  %v57_v23 = vld [vmem:[#allocation7 + $0x18] sm:$0xff] }
  0x2d   :  { %510 = vmatprep.subr.mxu0 %v743_v0  ;;  %545 = vmatprep.subr.mxu1 %v743_v0  ;;  %v91_v24 = vld [vmem:[#allocation7 + $0x128] sm:$0xff]  ;;  %v56_v25 = vld [vmem:[#allocation7 + $0x10] sm:$0xff]  ;;  %v90_v26 = vld [vmem:[#allocation7 + $0x120] sm:$0xff]  ;;  %p720_p5 = pnand %p719_p4, %p713_p1 }
  0x2e   :  { %511 = vmatpush3.msra.mxu0 %v66_v4  ;;  %546 = vmatpush3.msra.mxu1 %v98_v10  ;;  %v55_v27 = vld [vmem:[#allocation7 + $0x8] sm:$0xff]  ;;  %v89_v28 = vld [vmem:[#allocation7 + $0x118] sm:$0xff]  ;;  %v54_v29 = vld [vmem:[#allocation7] sm:$0xff] }
  0x2f   :  { %512 = vmatprep.subr.mxu0 %v743_v0  ;;  %547 = vmatprep.subr.mxu1 %v743_v0  ;;  %v52_v30 = vld [vmem:[#allocation2] sm:$0xff]  ;;  %v85_v31 = vld [vmem:[#allocation7 + $0xf8] sm:$0xff]  ;;  %v83_v34 = vld [vmem:[#allocation7 + $0xe8] sm:$0xff] }
  0x30   :  { %513 = vmatpush3.msra.mxu0 %v65_v6  ;;  %548 = vmatpush3.msra.mxu1 %v97_v12  ;;  %v88_v32 = vld [vmem:[#allocation7 + $0x110] sm:$0xff]  ;;  %v82_v35 = vld [vmem:[#allocation7 + $0xe0] sm:$0xff]  ;;  %v81_v36 = vld [vmem:[#allocation7 + $0xd8] sm:$0xff] }
  0x31   :  { %514 = vmatprep.subr.mxu0 %v743_v0  ;;  %549 = vmatprep.subr.mxu1 %v743_v0  ;;  %v84_v33 = vld [vmem:[#allocation7 + $0xf0] sm:$0xff]  ;;  %v79_v38 = vld [vmem:[#allocation7 + $0xc8] sm:$0xff]  ;;  %v78_v39 = vld [vmem:[#allocation7 + $0xc0] sm:$0xff] }
  0x32   :  { %515 = vmatpush3.msra.mxu0 %v64_v9  ;;  %550 = vmatpush3.msra.mxu1 %v96_v14  ;;  %v80_v37 = vld [vmem:[#allocation7 + $0xd0] sm:$0xff]  ;;  %v77_v40 = vld [vmem:[#allocation7 + $0xb8] sm:$0xff]  ;;  %v75_v42 = vld [vmem:[#allocation7 + $0xa8] sm:$0xff] }
  0x33   :  { %516 = vmatprep.subr.mxu0 %v743_v0  ;;  %551 = vmatprep.subr.mxu1 %v743_v0  ;;  %v76_v41 = vld [vmem:[#allocation7 + $0xb0] sm:$0xff]  ;;  %v74_v43 = vld [vmem:[#allocation7 + $0xa0] sm:$0xff]  ;;  %v73_v44 = vld [vmem:[#allocation7 + $0x98] sm:$0xff] }
  0x34   :  { %517 = vmatpush3.msra.mxu0 %v63_v11  ;;  %552 = vmatpush3.msra.mxu1 %v95_v16  ;;  %v87_v45 = vld [vmem:[#allocation7 + $0x108] sm:$0xff]  ;;  %v72_v46 = vld [vmem:[#allocation7 + $0x90] sm:$0xff]  ;;  %v86_v47 = vld [vmem:[#allocation7 + $0x100] sm:$0xff] }
  0x35   :  { %518 = vmatprep.subr.mxu0 %v743_v0  ;;  %553 = vmatprep.subr.mxu1 %v743_v0  ;;  %v71_v48 = vld [vmem:[#allocation7 + $0x88] sm:$0xff]  ;;  %v53_v49 = vld [vmem:[#allocation5] sm:$0xff]  ;;  %v70_v50 = vld [vmem:[#allocation7 + $0x80] sm:$0xff] }
  0x36   :  { %519 = vmatpush3.msra.mxu0 %v62_v13  ;;  %554 = vmatpush3.msra.mxu1 %v94_v18  ;;  %v117_v51 = vld [vmem:[#allocation7 + $0x1f8] sm:$0xff]  ;;  %v116_v52 = vld [vmem:[#allocation7 + $0x1f0] sm:$0xff]  ;;  %v115_v53 = vld [vmem:[#allocation7 + $0x1e8] sm:$0xff] }
  0x37   :  { %520 = vmatprep.subr.mxu0 %v743_v0  ;;  %555 = vmatprep.subr.mxu1 %v743_v0  ;;  %v114_v54 = vld [vmem:[#allocation7 + $0x1e0] sm:$0xff]  ;;  %v113_v55 = vld [vmem:[#allocation7 + $0x1d8] sm:$0xff]  ;;  %v112_v56 = vld [vmem:[#allocation7 + $0x1d0] sm:$0xff] }
  0x38   :  { %521 = vmatpush3.msra.mxu0 %v61_v15  ;;  %556 = vmatpush3.msra.mxu1 %v93_v20  ;;  %v111_v57 = vld [vmem:[#allocation7 + $0x1c8] sm:$0xff]  ;;  %v110_v58 = vld [vmem:[#allocation7 + $0x1c0] sm:$0xff]  ;;  %v109_v59 = vld [vmem:[#allocation7 + $0x1b8] sm:$0xff] }
  0x39   :  { %522 = vmatprep.subr.mxu0 %v743_v0  ;;  %557 = vmatprep.subr.mxu1 %v743_v0  ;;  %v108_v60 = vld [vmem:[#allocation7 + $0x1b0] sm:$0xff]  ;;  %v107_v61 = vld [vmem:[#allocation7 + $0x1a8] sm:$0xff]  ;;  %v106_v62 = vld [vmem:[#allocation7 + $0x1a0] sm:$0xff] }
  0x3a   :  { %523 = vmatpush3.msra.mxu0 %v60_v17  ;;  %558 = vmatpush3.msra.mxu1 %v92_v22  ;;  %v433_v63 = vld [vmem:[#allocation7 + $0x200] ss:$0 sm:$0xff]  ;;  %v105_v6 = vld [vmem:[#allocation7 + $0x198] sm:$0xff]  ;;  %v104_v8 = vld [vmem:[#allocation7 + $0x190] sm:$0xff] }
  0x3b   :  { %524 = vmatprep.subr.mxu0 %v743_v0  ;;  %559 = vmatprep.subr.mxu1 %v743_v0  ;;  %v103_v9 = vld [vmem:[#allocation7 + $0x188] sm:$0xff]  ;;  %v102_v10 = vld [vmem:[#allocation7 + $0x180] sm:$0xff]  ;;  %v435_v17 = vld [vmem:[#allocation7 + $0x210] ss:$0 sm:$0xff] }
  0x3c   :  { %525 = vmatpush3.msra.mxu0 %v59_v19  ;;  %560 = vmatpush3.msra.mxu1 %v91_v24  ;;  %v434_v11 = vld [vmem:[#allocation7 + $0x208] ss:$0 sm:$0xff] }
  0x3d   :  { %526 = vmatprep.subr.mxu0 %v743_v0  ;;  %561 = vmatprep.subr.mxu1 %v743_v0 }
  0x3e   :  { %527 = vmatpush3.msra.mxu0 %v58_v21  ;;  %562 = vmatpush3.msra.mxu1 %v90_v26 }
  0x3f   :  { %528 = vmatprep.subr.mxu0 %v743_v0  ;;  %563 = vmatprep.subr.mxu1 %v743_v0 }
  0x40   :  { %529 = vmatpush3.msra.mxu0 %v57_v23  ;;  %564 = vmatpush3.msra.mxu1 %v89_v28 }
  0x41   :  { %530 = vmatprep.subr.mxu0 %v743_v0  ;;  %565 = vmatprep.subr.mxu1 %v743_v0 }
  0x42   :  { %531 = vmatpush3.msra.mxu0 %v56_v25  ;;  %566 = vmatpush3.msra.mxu1 %v88_v32 }
  0x43   :  { %532 = vmatprep.subr.mxu0 %v743_v0  ;;  %567 = vmatprep.subr.mxu1 %v743_v0 }
  0x44   :  { %533 = vmatpush3.msra.mxu0 %v55_v27  ;;  %568 = vmatpush3.msra.mxu1 %v87_v45 }
  0x45   :  { %534 = vmatprep.subr.mxu0 %v743_v0  ;;  %569 = vmatprep.subr.mxu1 %v743_v0 }
  0x46   :  { %535 = vmatpush3.msra.mxu0 %v54_v29  ;;  %570 = vmatpush3.msra.mxu1 %v86_v47 }
  0x47   :  { %537 = vmatmul.mubr.f32.vlgmr.msra.gmra.mxu0 %v52_v30  ;;  %574 = vmatprep.subr.mxu0 %v743_v0 }
  0x48   :  { %575 = vmatpush3.msra.mxu0 %v85_v31  ;;  %606 = vmatprep.mubr.msk.f32.mxu0 %vm744_vm0, %v743_v0 }
  0x49   :  { %576 = vmatprep.subr.mxu0 %v743_v0  ;;  %572 = vmatmul.mubr.f32.vlgmr.msra.gmra.mxu1 %v53_v49 }
  0x4a   :  { %577 = vmatpush3.msra.mxu0 %v84_v33  ;;  %609 = vmatprep.subr.mxu1 %v743_v0 }
  0x4b   :  { %578 = vmatprep.subr.mxu0 %v743_v0  ;;  %641 = vmatprep.mubr.msk.f32.mxu1 %vm744_vm0, %v743_v0 }
  0x4c   :  { %579 = vmatpush3.msra.mxu0 %v83_v34  ;;  %610 = vmatpush3.msra.mxu1 %v117_v51 }
  0x4d   :  { %580 = vmatprep.subr.mxu0 %v743_v0  ;;  %611 = vmatprep.subr.mxu1 %v743_v0 }
  0x4e   :  { %581 = vmatpush3.msra.mxu0 %v82_v35  ;;  %612 = vmatpush3.msra.mxu1 %v116_v52 }
  0x4f   :  { %582 = vmatprep.subr.mxu0 %v743_v0  ;;  %613 = vmatprep.subr.mxu1 %v743_v0 }
  0x50   :  { %583 = vmatpush3.msra.mxu0 %v81_v36  ;;  %614 = vmatpush3.msra.mxu1 %v115_v53 }
  0x51   :  { %584 = vmatprep.subr.mxu0 %v743_v0  ;;  %615 = vmatprep.subr.mxu1 %v743_v0 }
  0x52   :  { %585 = vmatpush3.msra.mxu0 %v80_v37  ;;  %616 = vmatpush3.msra.mxu1 %v114_v54 }
  0x53   :  { %586 = vmatprep.subr.mxu0 %v743_v0  ;;  %617 = vmatprep.subr.mxu1 %v743_v0 }
  0x54   :  { %587 = vmatpush3.msra.mxu0 %v79_v38  ;;  %618 = vmatpush3.msra.mxu1 %v113_v55 }
  0x55   :  { %588 = vmatprep.subr.mxu0 %v743_v0  ;;  %619 = vmatprep.subr.mxu1 %v743_v0 }
  0x56   :  { %589 = vmatpush3.msra.mxu0 %v78_v39  ;;  %620 = vmatpush3.msra.mxu1 %v112_v56 }
  0x57   :  { %590 = vmatprep.subr.mxu0 %v743_v0  ;;  %621 = vmatprep.subr.mxu1 %v743_v0 }
  0x58   :  { %591 = vmatpush3.msra.mxu0 %v77_v40  ;;  %622 = vmatpush3.msra.mxu1 %v111_v57 }
  0x59   :  { %592 = vmatprep.subr.mxu0 %v743_v0  ;;  %623 = vmatprep.subr.mxu1 %v743_v0 }
  0x5a   :  { %593 = vmatpush3.msra.mxu0 %v76_v41  ;;  %624 = vmatpush3.msra.mxu1 %v110_v58 }
  0x5b   :  { %594 = vmatprep.subr.mxu0 %v743_v0  ;;  %625 = vmatprep.subr.mxu1 %v743_v0 }
  0x5c   :  { %595 = vmatpush3.msra.mxu0 %v75_v42  ;;  %626 = vmatpush3.msra.mxu1 %v109_v59 }
  0x5d   :  { %596 = vmatprep.subr.mxu0 %v743_v0  ;;  %627 = vmatprep.subr.mxu1 %v743_v0 }
  0x5e   :  { %597 = vmatpush3.msra.mxu0 %v74_v43  ;;  %628 = vmatpush3.msra.mxu1 %v108_v60 }
  0x5f   :  { %598 = vmatprep.subr.mxu0 %v743_v0  ;;  %629 = vmatprep.subr.mxu1 %v743_v0 }
  0x60   :  { %599 = vmatpush3.msra.mxu0 %v73_v44  ;;  %630 = vmatpush3.msra.mxu1 %v107_v61 }
  0x61   :  { %600 = vmatprep.subr.mxu0 %v743_v0  ;;  %631 = vmatprep.subr.mxu1 %v743_v0 }
  0x62   :  { %601 = vmatpush3.msra.mxu0 %v72_v46  ;;  %632 = vmatpush3.msra.mxu1 %v106_v62 }
  0x63   :  { %602 = vmatprep.subr.mxu0 %v743_v0  ;;  %633 = vmatprep.subr.mxu1 %v743_v0 }
  0x64   :  { %603 = vmatpush3.msra.mxu0 %v71_v48  ;;  %634 = vmatpush3.msra.mxu1 %v105_v6 }
  0x65   :  { %604 = vmatprep.subr.mxu0 %v743_v0  ;;  %635 = vmatprep.subr.mxu1 %v743_v0 }
  0x66   :  { %605 = vmatpush3.msra.mxu0 %v70_v50  ;;  %636 = vmatpush3.msra.mxu1 %v104_v8 }
  0x67   :  { %637 = vmatprep.subr.mxu1 %v743_v0 }
  0x68   :  { %638 = vmatpush3.msra.mxu1 %v103_v9 }
  0x69   :  { %639 = vmatprep.subr.mxu1 %v743_v0 }
  0x6a   :  { %640 = vmatpush3.msra.mxu1 %v102_v10 }
 0x107   :  { %v191_v1 = vpop.f32.mrf.mxu0 }
 0x108   :  { %v192_v2 = vadd.f32 %v433_v63, %v191_v1 }
 0x109   :  { %v538_v3 = vpop.f32.mrf.mxu0  ;;  %v262_v5 = vpop.f32.mrf.mxu1 }
 0x10a   :  { %v195_v4 = vmax.f32 %v192_v2, 0.0 }
 0x10b   :  { %v573_v7 = vpop.f32.mrf.mxu1 }
 0x10c   :  { %607 = vmatmul.mubr.f32.vlgmr.msra.gmra.mxu0 %v195_v4 }
 0x1cc   :  { %v332_v12 = vpop.f32.mrf.mxu0 }
 0x1cd   :  { %v333_v13 = vadd.f32 %v332_v12, %v262_v5 }
 0x1ce   :  { %v608_v14 = vpop.f32.mrf.mxu0 }
 0x1cf   :  { %v340_v15 = vadd.f32 %v434_v11, %v333_v13 }
 0x1d1   :  { %v341_v16 = vmax.f32 %v340_v15, 0.0 }
 0x1d3   :  { %642 = vmatmul.mubr.f32.vlgmr.msra.gmra.mxu1 %v341_v16 }
 0x293   :  { %v412_v18 = vpop.f32.mrf.mxu1 }
 0x294   :  { %v413_v19 = vadd.f32 %v435_v17, %v412_v18 }
 0x295   :  { %v643_v20 = vpop.f32.mrf.mxu1 }
 0x296   :  { %416 = vst [vmem:[#allocation8] sm:$0xff] %v413_v19 }
 0x297   :  { %723 = shalt.err (!%p720_p5)
}
 0x298   :  { %426 = dma.vmem_to_hbm [thread:$0]  %s424_s2, 128, %s853_s3, [#allocation4]  }
 0x299   :  { %736 = dma.done.wait [#allocation4], 128  }
 0x29a   :  { %737 = vsyncadd [#allocation4], 4294967168 }
 0x29b   :  { %430 = vsyncpa [#allocation3], 1 }
 0x29c   :  { %431 = vsyncpa [#allocation6], 1 }
 0x29d   :  { %432 = vsyncpa [#allocation4], 1 }

</bundles_post_ra>
